<compile_context>
chip_gen: v5e
topology: v5e:2x2
jax: 0.10.0
libtpu: 0.0.40
codegen_flags: <defaults>
</compile_context>

<pallas_src>
import math
from functools import reduce

import jax
import jax.numpy as jnp
from jax.experimental import pallas as pl
from jax.experimental.pallas import tpu as pltpu


def _prod(xs):
    return int(reduce(lambda a, b: a * b, xs, 1))


def _round_up(x, m):
    return ((x + m - 1) // m) * m


# ----------------------------------------------------------------------------
# Fused Pallas kernel: one row tile of x against the (VMEM-resident) effective
# weight, bias added in the epilogue before the single store.
# ----------------------------------------------------------------------------
def _tt_fused_kernel(x_ref, w_ref, b_ref, o_ref):
    # x_ref: (TM, in_features)   w_ref: (in_features, out_features)
    # b_ref: (1, out_features) f32   o_ref: (TM, out_features)
    acc = jnp.dot(x_ref[...], w_ref[...], preferred_element_type=jnp.float32)
    o_ref[...] = (acc + b_ref[...]).astype(o_ref.dtype)


# ----------------------------------------------------------------------------
# TT-core merge (tiny, batch-independent glue).  Produces the dense effective
# weight W with the exact row-major multi-index flattening of einsum_forward.
# ----------------------------------------------------------------------------
def merge_tt_cores(cores):
    # A carries shape (I, J, r): I = prod(input dims so far), J = prod(output dims so far)
    r0, n1, m1, r1 = cores[0].shape
    assert r0 == 1
    A = cores[0].reshape(n1, m1, r1)
    for core in cores[1:]:
        r, n, m, rn = core.shape
        I, J, rA = A.shape
        assert rA == r
        T = jnp.tensordot(A, core, axes=([2], [0]))   # (I, J, n, m, r')
        T = jnp.transpose(T, (0, 2, 1, 3, 4))          # (I, n, J, m, r')
        A = T.reshape(I * n, J * m, rn)
    I, J, rlast = A.shape
    assert rlast == 1
    return A.reshape(I, J)                              # (in_features, out_features)


# ----------------------------------------------------------------------------
# TTLinear forward
# ----------------------------------------------------------------------------
def tt_linear_forward(x, cores, bias, input_dims, output_dims, *, compute_dtype=None):
    in_features = _prod(input_dims)
    out_features = _prod(output_dims)
    lead = x.shape[:-1]
    assert x.shape[-1] == in_features
    B = _prod(lead) if lead else 1
    out_dtype = x.dtype

    # Effective weight (reused across the whole batch; negligible cost).
    W = merge_tt_cores(cores)

    x2 = x.reshape(B, in_features)
    if compute_dtype is not None:
        x2 = x2.astype(compute_dtype)
        W = W.astype(compute_dtype)

    if bias is None:
        b2 = jnp.zeros((1, out_features), jnp.float32)
    else:
        b2 = bias.reshape(1, out_features).astype(jnp.float32)

    # ---- row tiling: fixed tile + cdiv grid + explicit tail padding ----------
    esz_in = jnp.dtype(x2.dtype).itemsize
    esz_out = jnp.dtype(out_dtype).itemsize
    TM = 512 if B >= 512 else _round_up(max(B, 1), 8)
    # keep double-buffered blocks + resident W well under the VMEM budget
    def _vmem_bytes(tm):
        return (2 * tm * in_features * esz_in
                + 2 * tm * out_features * esz_out
                + 2 * in_features * out_features * esz_in
                + 2 * out_features * 4)
    while TM > 8 and _vmem_bytes(TM) > 24 * 1024 * 1024:
        TM //= 2
    TM = _round_up(TM, 8)

    grid_m = pl.cdiv(B, TM)
    B_pad = grid_m * TM
    if B_pad != B:
        x2 = jnp.pad(x2, ((0, B_pad - B), (0, 0)))

    x_spec = pl.BlockSpec((TM, in_features), lambda i: (i, 0))
    if grid_m >= 4:
        # deeper input buffering to hide exposed DMA on long row grids
        x_spec = pl.BlockSpec((TM, in_features), lambda i: (i, 0),
                              pipeline_mode=pl.Buffered(3))

    flops = 2 * B_pad * in_features * out_features
    bytes_accessed = (B_pad * in_features * esz_in
                      + in_features * out_features * esz_in
                      + B_pad * out_features * esz_out
                      + out_features * 4)

    y = pl.pallas_call(
        _tt_fused_kernel,
        out_shape=jax.ShapeDtypeStruct((B_pad, out_features), out_dtype),
        grid=(grid_m,),
        in_specs=[
            x_spec,
            # grid-invariant block indices -> W / bias are fetched once and stay
            # resident in VMEM for the whole row grid (no per-step re-DMA).
            pl.BlockSpec((in_features, out_features), lambda i: (0, 0)),
            pl.BlockSpec((1, out_features), lambda i: (0, 0)),
        ],
        out_specs=pl.BlockSpec((TM, out_features), lambda i: (i, 0)),
        compiler_params=pltpu.CompilerParams(
            dimension_semantics=("parallel",),        # 2 TCs on v7x shard the rows
            vmem_limit_bytes=32 * 1024 * 1024,        # explicit headroom (v7x: 64 MiB phys)
        ),
        cost_estimate=pl.CostEstimate(
            flops=flops, transcendentals=0, bytes_accessed=bytes_accessed),
    )(x2, W, b2)

    if B_pad != B:
        y = y[:B]
    return y.reshape(*lead, out_features)


# ----------------------------------------------------------------------------
# Deterministic parameter construction (synthetic; no TT-SVD of a checkpoint)
# ----------------------------------------------------------------------------
def make_tt_linear_params(key, input_dims, output_dims, ranks, dtype=jnp.float32):
    # TODO(synk): the PyTorch __init__ builds cores via TTMatrix (TT-SVD of a random
    # matrix); here the cores are initialized directly and deterministically with the
    # same uniform(-1,1)/sqrt(in_features) scale.
    in_features = _prod(input_dims)
    out_features = _prod(output_dims)
    full_ranks = [1] + list(ranks) + [1]
    d = len(input_dims)
    keys = jax.random.split(key, d + 1)
    cores = []
    for k in range(d):
        shape = (full_ranks[k], input_dims[k], output_dims[k], full_ranks[k + 1])
        u = jax.random.uniform(keys[k], shape, dtype=dtype)
        cores.append((2.0 * u - 1.0) / math.sqrt(in_features))
    ub = jax.random.uniform(keys[d], (out_features,), dtype=dtype)
    bias = (2.0 * ub - 1.0) / math.sqrt(out_features)
    return cores, bias


# ----------------------------------------------------------------------------
# Pure-JAX reference (independent full-W einsum) for validation
# ----------------------------------------------------------------------------
def tt_linear_reference(x, cores, bias, input_dims, output_dims):
    in_features = _prod(input_dims)
    out_features = _prod(output_dims)
    g1, g2, g3 = cores
    W = jnp.einsum("xiap,pjbq,qkcy->ijkabc", g1, g2, g3).reshape(
        in_features, out_features)
    y = x.reshape(-1, in_features) @ W + bias
    return y.reshape(*x.shape[:-1], out_features)


# ----------------------------------------------------------------------------
if __name__ == "__main__":
    # in_features = 4*4*2 = 32, out_features = 4*4*4 = 64, TT ranks [8, 8],
    # x of shape (batch=2, seq=8, hidden=32).
    input_dims = [4, 4, 2]
    output_dims = [4, 4, 4]
    ranks = [8, 8]

    key = jax.random.PRNGKey(0)
    k_param, k_x = jax.random.split(key)
    cores, bias = make_tt_linear_params(k_param, input_dims, output_dims, ranks)
    x = jax.random.uniform(k_x, (2, 8, 32), dtype=jnp.float32)

    ref = tt_linear_reference(x, cores, bias, input_dims, output_dims)

    # f32 path (strict check)
    out = tt_linear_forward(x, cores, bias, input_dims, output_dims)
    out = jax.block_until_ready(out)
    assert out.shape == (2, 8, 64), out.shape
    assert jnp.allclose(out, ref, atol=1e-4, rtol=1e-4), (
        float(jnp.max(jnp.abs(out - ref))))

    # bf16 compute path (v6e/v7x MXU fast path), f32 accumulation — loose check
    out_bf16 = tt_linear_forward(x, cores, bias, input_dims, output_dims,
                                 compute_dtype=jnp.bfloat16)
    out_bf16 = jax.block_until_ready(out_bf16)
    assert jnp.allclose(out_bf16, ref, atol=1e-2, rtol=1e-2), (
        float(jnp.max(jnp.abs(out_bf16 - ref))))

    print("KERNEL_OK")
</pallas_src>

<mosaic_0001>
module attributes {stable_mosaic.version = 11 : i64} {
  func.func @_tt_fused_kernel(%arg0: i32, %arg1: memref<16x32xf32, #tpu.memory_space<vmem>>, %arg2: memref<32x64xf32, #tpu.memory_space<vmem>>, %arg3: memref<1x64xf32, #tpu.memory_space<vmem>>, %arg4: memref<16x64xf32, #tpu.memory_space<vmem>>) attributes {dimension_semantics = [#tpu.dimension_semantics<parallel>], iteration_bounds = array<i64: 1>, scalar_prefetch = 0 : i64, scratch_operands = 0 : i64, tpu.core_type = #tpu.core_type<tc>, window_params = [{transform_indices = @transform_0, window_bounds = array<i64: 16, 32>}, {pipeline_mode = #tpu.pipeline_mode<synchronous>, transform_indices = @transform_1, window_bounds = array<i64: 32, 64>}, {pipeline_mode = #tpu.pipeline_mode<synchronous>, transform_indices = @transform_2, window_bounds = array<i64: 1, 64>}, {transform_indices = @transform_3, window_bounds = array<i64: 16, 64>}]} {
    %c0 = arith.constant 0 : index
    %c0_0 = arith.constant 0 : index
    %0 = vector.load %arg1[%c0, %c0_0] : memref<16x32xf32, #tpu.memory_space<vmem>>, vector<16x32xf32>
    %c0_1 = arith.constant 0 : index
    %c0_2 = arith.constant 0 : index
    %1 = vector.load %arg2[%c0_1, %c0_2] : memref<32x64xf32, #tpu.memory_space<vmem>>, vector<32x64xf32>
    %cst = arith.constant dense<0.000000e+00> : vector<16x64xf32>
    %2 = tpu.matmul %0, %1, %cst {dimension_numbers = #tpu.dot_dimension_numbers<[1], [0], [0], [1], [0, 0, 1, 1], [], []>} : vector<16x32xf32>, vector<32x64xf32>, vector<16x64xf32> -> vector<16x64xf32>
    %c0_3 = arith.constant 0 : index
    %c0_4 = arith.constant 0 : index
    %3 = vector.load %arg3[%c0_3, %c0_4] : memref<1x64xf32, #tpu.memory_space<vmem>>, vector<1x64xf32>
    %4 = vector.broadcast %3 : vector<1x64xf32> to vector<16x64xf32>
    %5 = arith.addf %2, %4 : vector<16x64xf32>
    %c0_5 = arith.constant 0 : index
    %c0_6 = arith.constant 0 : index
    %6 = vector.load %arg4[%c0_5, %c0_6] : memref<16x64xf32, #tpu.memory_space<vmem>>, vector<16x64xf32>
    tpu.vector_store %arg4[%c0_5, %c0_6], %5 {strides = array<i32>} : memref<16x64xf32, #tpu.memory_space<vmem>>, vector<16x64xf32>,
    return
  }
  func.func @transform_0(%arg0: i32) -> (i32, i32) {
    %c0_i32 = arith.constant 0 : i32
    %c0_i32_0 = arith.constant 0 : i32
    return %arg0, %c0_i32 : i32, i32
  }
  func.func @transform_1(%arg0: i32) -> (i32, i32) {
    %c0_i32 = arith.constant 0 : i32
    %c0_i32_0 = arith.constant 0 : i32
    %c0_i32_1 = arith.constant 0 : i32
    return %c0_i32, %c0_i32_0 : i32, i32
  }
  func.func @transform_2(%arg0: i32) -> (i32, i32) {
    %c0_i32 = arith.constant 0 : i32
    %c0_i32_0 = arith.constant 0 : i32
    %c0_i32_1 = arith.constant 0 : i32
    return %c0_i32, %c0_i32_0 : i32, i32
  }
  func.func @transform_3(%arg0: i32) -> (i32, i32) {
    %c0_i32 = arith.constant 0 : i32
    %c0_i32_0 = arith.constant 0 : i32
    return %arg0, %c0_i32 : i32, i32
  }
}

</mosaic_0001>

<bundles_post_ra>
// kernel: tpu_custom_call.1
= control target key start
LH: loop header
LB: loop body
LE: loop exit
PB: predicated region body
PF: predicated region fallthrough
CT: control target
= control target key end

     0   :  { %8 = vsyncpa [#allocation3], 0  ;;  %s246_s0 = inlined_call_operand.hbm [shape: f32[16,32], index: 0, kind: input, shape index: {}]   ;;  %s247_s1 = inlined_call_operand.hbm [shape: f32[32,64], index: 1, kind: input, shape index: {}]   ;;  %s248_s2 = inlined_call_operand.vmem [shape: f32[1,64], index: 2, kind: input, shape index: {}]   ;;  %s249_s3 = inlined_call_operand.hbm [shape: f32[16,64], index: 3, kind: output, shape index: {}]  }
   0x1   :  { %9 = vsyncpa [#allocation6], 0 }
   0x2   :  { %10 = vsyncpa [#allocation4], 0  ;;  %s15_s14 = sshll.u32 %s246_s0, 4  ;;  %s200_s15 = smov [#allocation2]   ;;  %s16_s14 = int_to_ptr.hbm [resolvable:$true] %s15_s14 }
   0x3   :  { %s17_s16 = sshll.u32 %s200_s15, 4  ;;  %s28_s19 = sshll.u32 %s247_s1, 4  ;;  %s18_s16 = int_to_ptr.vmem [resolvable:$true] %s17_s16  ;;  %s29_s19 = int_to_ptr.hbm [resolvable:$true] %s28_s19 }
   0x4   :  { %s201_s20 = smov 128   ;;  %s202_s21 = smov 8  }
   0x5   :  { %23 = dma.hbm_to_vmem [thread:$0]  %s16_s14, 256, %s18_s16, [#allocation3], %s201_s20, %s201_s20, %s202_s21  }
   0x6   :  { %s203_s22 = smov [#allocation5]  }
   0x7   :  { %s30_s23 = sshll.u32 %s203_s22, 4  ;;  %s31_s23 = int_to_ptr.vmem [resolvable:$true] %s30_s23 }
   0x8   :  { %36 = dma.hbm_to_vmem [thread:$0]  %s29_s19, 512, %s31_s23, [#allocation6], %s201_s20, %s201_s20, %s202_s21  }
   0x9   :  { %194 = dma.done.wait [#allocation3], 256  }
   0xa   :  { %195 = vsyncadd [#allocation3], 4294967040 }
   0xb   :  { %196 = dma.done.wait [#allocation6], 512  }
   0xc   :  { %197 = vsyncadd [#allocation6], 4294966784  ;;  %v52_v0 = vld [vmem:[#allocation5 + $0x18] sm:$0xff]  ;;  %v51_v1 = vld [vmem:[#allocation5 + $0x10] sm:$0xff]  ;;  %vm57_vm0 = vcmask 261120   ;;  %s204_s24 = smov [#allocation7]  }
   0xd   :  { %76 = vmatpush.msra.mxu0 %v52_v0  ;;  %112 = vmatpush.msra.mxu1 %v52_v0  ;;  %v50_v2 = vld [vmem:[#allocation5 + $0x8] sm:$0xff]  ;;  %v49_v3 = vld [vmem:[#allocation5] sm:$0xff]  ;;  %v47_v4 = vld [vmem:[#allocation2] sm:$0xff]  ;;  %s94_s25 = sshll.u32 %s204_s24, 4  ;;  %s96_s28 = sshll.u32 %s249_s3, 4  ;;  %vm87_vm1 = vcmask 523264   ;;  %s95_s25 = int_to_ptr.vmem [resolvable:$true] %s94_s25  ;;  %s97_s28 = int_to_ptr.hbm [resolvable:$true] %s96_s28 }
   0xe   :  { %v48_v5 = vld [vmem:[#allocation2 + $0x8] sm:$0xff]  ;;  %v121_v6 = vld [vmem:[%s248_s2] ss:$0 sm:$0xff] }
   0xf   :  { %77 = vmatpush.msra.mxu0 %v51_v1  ;;  %113 = vmatpush.msra.mxu1 %v51_v1 }
  0x11   :  { %78 = vmatpush.msra.mxu0 %v50_v2  ;;  %114 = vmatpush.msra.mxu1 %v50_v2 }
  0x13   :  { %79 = vmatpush.msra.mxu0 %v49_v3  ;;  %115 = vmatpush.msra.mxu1 %v49_v3 }
  0x14   :  { %110 = vmatmul.msk.f32.vlgmr.msra.gmra.mxu0 %vm57_vm0, %v47_v4  ;;  %111 = vmatmul.msk.f32.vlgmr.msra.gmra.mxu1 %vm57_vm0, %v48_v5 }
  0x91   :  { %v81_v7 = vpop.f32.mrf.mxu0  ;;  %v84_v8 = vpop.f32.mrf.mxu1 }
  0x92   :  { %v82_v9 = vadd.f32 %v121_v6, %v81_v7  ;;  %v85_v10 = vadd.f32 %v121_v6, %v84_v8 }
  0x94   :  { %88 = vst.msk [vmem:[#allocation7] sm:$0xff] %vm87_vm1, %v82_v9 }
  0x95   :  { %89 = vst.msk [vmem:[#allocation7 + $0x8] sm:$0xff] %vm87_vm1, %v85_v10 }
  0x96   :  { %102 = dma.vmem_to_hbm [thread:$0]  %s95_s25, 256, %s97_s28, [#allocation4], %s201_s20, %s201_s20, %s202_s21  }
  0x97   :  { %198 = dma.done.wait [#allocation4], 256  }
  0x98   :  { %199 = vsyncadd [#allocation4], 4294967040 }
  0x99   :  { %107 = vsyncpa [#allocation3], 1 }
  0x9a   :  { %108 = vsyncpa [#allocation6], 1 }
  0x9b   :  { %109 = vsyncpa [#allocation4], 1 }

</bundles_post_ra>
